<compile_context>
chip_gen: v7x
topology: tpu7x:2x2x1
jax: 0.10.0
libtpu: 0.0.40
codegen_flags: <defaults>
</compile_context>

<pallas_src>
import functools
import math

import jax
import jax.numpy as jnp
from jax import lax
from jax.experimental import pallas as pl
from jax.experimental.pallas import tpu as pltpu


def _round_up(v: int, m: int) -> int:
    return ((v + m - 1) // m) * m


def _cdiv(a: int, b: int) -> int:
    return -(-a // b)


def _as_i32(v: int) -> int:
    v &= 0xFFFFFFFF
    return v - (1 << 32) if v >= (1 << 31) else v


# Odd mixing constants (murmur3 / golden-ratio style), expressed as signed int32.
_K_ROW = _as_i32(0x9E3779B1)
_K_COL = _as_i32(0x7FEB352D)
_K_SEED = _as_i32(0x846CA68B)
_M1 = _as_i32(0x85EBCA6B)
_M2 = _as_i32(0xC2B2AE35)


def _fmix32(h):
    """murmur3 finalizer on int32 arrays.

    Logical right shift is emulated with arithmetic shift + mask so everything stays in
    signed int32 (portable across Mosaic and the interpret path)."""
    h = h ^ ((h >> 16) & jnp.int32(0x0000FFFF))
    h = h * jnp.int32(_M1)
    h = h ^ ((h >> 13) & jnp.int32(0x0007FFFF))
    h = h * jnp.int32(_M2)
    h = h ^ ((h >> 16) & jnp.int32(0x0000FFFF))
    return h


def _custom_linear_kernel(seed_ref, x_ref, w_ref, b_ref, o_ref, *, p, training):
    # Grid/scalar context is bound ONLY at the top level (never inside pl.when bodies).
    i = pl.program_id(0)
    j = pl.program_id(1)
    k = pl.program_id(2)
    nk = pl.num_programs(2)
    seed_val = seed_ref[0]

    # Hot path: one bf16 MXU matmul per step, f32 accumulation into the resident output tile.
    prod = jnp.dot(x_ref[...], w_ref[...], preferred_element_type=jnp.float32)

    @pl.when(k == 0)
    def _set():
        o_ref[...] = prod          # no zero-fill: direct assign on the first K step

    @pl.when(k > 0)
    def _accumulate():
        o_ref[...] += prod

    @pl.when(k == nk - 1)
    def _epilogue():
        # Bias + ReLU in f32, once per output tile.
        y = o_ref[...] + b_ref[...]
        y = jnp.maximum(y, jnp.float32(0.0))

        # Inverted dropout (matches torch.nn.Dropout train mode; identity in eval).
        if training and p > 0.0:
            if p >= 1.0:
                y = jnp.zeros_like(y)
            else:
                tm, tn = o_ref.shape
                # Stateless hash of (seed, global_row, global_col): mask is independent of
                # tile sizes / grid layout and seeds cannot alias across tiles.
                rows = lax.broadcasted_iota(jnp.int32, (tm, tn), 0) + i * tm
                cols = lax.broadcasted_iota(jnp.int32, (tm, tn), 1) + j * tn
                h = (rows * jnp.int32(_K_ROW)
                     + cols * jnp.int32(_K_COL)
                     + seed_val * jnp.int32(_K_SEED))
                h = _fmix32(h)
                pos = h & jnp.int32(0x7FFFFFFF)     # uniform over [0, 2^31)
                # keep with prob (1 - p), up to 2^-31 rounding of the threshold.
                thr = min(int(p * 2147483648.0 + 0.5), 2147483647)
                keep = pos >= jnp.int32(thr)
                y = jnp.where(keep, y * jnp.float32(1.0 / (1.0 - p)), jnp.float32(0.0))

        # TODO(synk): BatchNorm1d branch (self.dobn) omitted — default batch_norm=False; as
        # written in the PyTorch module it is only shape-valid when in_features == out_features.
        o_ref[...] = y


def _pick_tile_m(B: int, tm_max: int):
    """Minimal-padding batch tiling: tm is a multiple of 8, B pads to at most tm*grid_m."""
    b8 = _round_up(max(B, 1), 8)
    tm_max = max(8, _round_up(tm_max, 8))
    gm = _cdiv(b8, tm_max)
    tm = _round_up(_cdiv(b8, gm), 8)
    return tm, tm * gm


def _pick_tile_128(dim: int, t_max: int):
    """Largest multiple of 128 <= t_max that evenly divides round_up(dim, 128) (no extra pad).

    Prefers 256+ when the dim allows it (v6e/v7x MXU is 2x256^2); 128 always divides."""
    dim128 = _round_up(max(dim, 1), 128)
    t_max = max(128, (t_max // 128) * 128)
    best = 128
    t = 128
    while t <= min(t_max, dim128):
        if dim128 % t == 0:
            best = t
        t += 128
    return best, dim128


def custom_linear(x, w, b, *, p=0.5, training=False, seed=0,
                  tm=256, tn=256, tk=512, compute_dtype=jnp.bfloat16):
    """Forward pass of CustomLinear(batch_norm=False).

    x: (B, IN) float32 (or compute_dtype)
    w: (IN, OUT)       (transposed PyTorch weight; pre-cast/pre-pad once for repeated calls)
    b: (OUT,)  float32
    Returns float32 (B, OUT).
    """
    B, IN = x.shape
    IN_w, OUT = w.shape
    assert IN_w == IN, (IN_w, IN)

    tm, Bp = _pick_tile_m(B, tm)
    tk, INp = _pick_tile_128(IN, tk)
    tn, OUTp = _pick_tile_128(OUT, tn)

    grid_m = Bp // tm
    grid_n = OUTp // tn
    grid_k = INp // tk

    # v7x megacore: guarantee >= 2 parallel tiles when possible (2 TensorCores per chip).
    if grid_m * grid_n == 1 and tn >= 256:
        tn //= 2
        grid_n = OUTp // tn

    # Cast + pad (no-ops when already aligned / already in compute_dtype).  For repeated
    # calls, do this once to the weight outside the hot path and pass the result in.
    xp = x if x.dtype == compute_dtype else x.astype(compute_dtype)
    wp = w if w.dtype == compute_dtype else w.astype(compute_dtype)
    if (Bp, INp) != (B, IN):
        xp = jnp.pad(xp, ((0, Bp - B), (0, INp - IN)))
    if (INp, OUTp) != (IN, OUT):
        wp = jnp.pad(wp, ((0, INp - IN), (0, OUTp - OUT)))
    bp = b if b.dtype == jnp.float32 else b.astype(jnp.float32)
    if OUTp != OUT:
        bp = jnp.pad(bp, (0, OUTp - OUT))
    bp = bp.reshape(1, OUTp)

    seed_arr = jnp.array([seed], dtype=jnp.int32)
    grid = (grid_m, grid_n, grid_k)
    kernel = functools.partial(_custom_linear_kernel, p=float(p), training=bool(training))

    # VMEM estimate: double-buffered input tiles + double-buffered f32 output tile + bias.
    cb = jnp.dtype(compute_dtype).itemsize
    vmem_est = 2 * (tm * tk + tk * tn) * cb + 2 * tm * tn * 4 + 2 * tn * 4
    cparams = dict(dimension_semantics=("parallel", "parallel", "arbitrary"))
    if vmem_est > (12 << 20):
        # Generation-safe cap: v7x has 64 MiB physical VMEM (32 MiB scoped default);
        # v5e's scoped default is only 16 MiB despite 128 MiB physical.
        cparams["vmem_limit_bytes"] = min(64 << 20, int(vmem_est * 2))

    out = pl.pallas_call(
        kernel,
        out_shape=jax.ShapeDtypeStruct((Bp, OUTp), jnp.float32),
        grid_spec=pltpu.PrefetchScalarGridSpec(
            num_scalar_prefetch=1,  # seed lands in SMEM; passed to every index_map
            grid=grid,
            in_specs=[
                pl.BlockSpec((tm, tk), lambda i, j, k, seed: (i, k)),
                pl.BlockSpec((tk, tn), lambda i, j, k, seed: (k, j)),
                pl.BlockSpec((1, tn), lambda i, j, k, seed: (0, j)),
            ],
            out_specs=pl.BlockSpec((tm, tn), lambda i, j, k, seed: (i, j)),
        ),
        compiler_params=pltpu.CompilerParams(**cparams),
        cost_estimate=pl.CostEstimate(
            flops=2 * Bp * INp * OUTp,
            transcendentals=0,
            bytes_accessed=Bp * INp * cb * grid_n + INp * OUTp * cb * grid_m + Bp * OUTp * 4,
        ),
    )(seed_arr, xp, wp, bp)

    if Bp != B or OUTp != OUT:
        out = out[:B, :OUT]
    return out


if __name__ == "__main__":
    # Small shapes consistent with the module's forward: 2-D input (batch, features).
    batch, in_features, out_features = 16, 384, 256

    key = jax.random.PRNGKey(0)
    kx, kw, kb = jax.random.split(key, 3)

    # Deterministic parameter init mirroring nn.Linear's uniform(-1/sqrt(in), 1/sqrt(in)).
    bound = 1.0 / math.sqrt(in_features)
    w = jax.random.uniform(kw, (in_features, out_features), jnp.float32, -bound, bound)
    b = jax.random.uniform(kb, (out_features,), jnp.float32, -bound, bound)
    x = jax.random.normal(kx, (batch, in_features), jnp.float32)

    # Reference with the same bf16 input rounding the kernel uses (accumulation in f32).
    xr = x.astype(jnp.bfloat16).astype(jnp.float32)
    wr = w.astype(jnp.bfloat16).astype(jnp.float32)
    ref = jnp.maximum(xr @ wr + b[None, :], 0.0)

    # Eval-mode forward (Dropout identity).  Small tiles so the problem runs a real
    # multi-step (M, N, K) = (1, 2, 3) grid; production defaults are tm/tn/tk = 256/256/512.
    out = custom_linear(x, w, b, p=0.5, training=False, tn=128, tk=128)
    out = jax.block_until_ready(out)
    assert out.shape == (batch, out_features)
    assert jnp.allclose(out, ref, atol=2e-3, rtol=2e-3)

    # Eval-mode forward with default (auto-clamped) tiles.
    out_d = jax.block_until_ready(custom_linear(x, w, b, p=0.5, training=False))
    assert jnp.allclose(out_d, ref, atol=2e-3, rtol=2e-3)

    # Train-mode forward: every element must be either dropped (0) or scaled by 1/(1-p).
    p = 0.5
    out_tr = jax.block_until_ready(
        custom_linear(x, w, b, p=p, training=True, seed=123, tn=128, tk=128))
    scaled = ref / (1.0 - p)
    ok = jnp.logical_or(out_tr == 0.0, jnp.isclose(out_tr, scaled, atol=2e-3, rtol=2e-3))
    assert out_tr.shape == (batch, out_features)
    assert bool(jnp.all(ok))
    pos = ref > 0.0
    assert bool(jnp.any(jnp.logical_and(pos, out_tr == 0.0)))  # some positives were dropped
    assert bool(jnp.any(jnp.logical_and(pos, out_tr > 0.0)))   # some positives survived

    print("KERNEL_OK")
</pallas_src>

<mosaic_0001>
module attributes {stable_mosaic.version = 11 : i64} {
  func.func @_custom_linear_kernel(%arg0: i32, %arg1: i32, %arg2: i32, %arg3: memref<1xi32, #tpu.memory_space<smem>>, %arg4: memref<16x128xbf16, #tpu.memory_space<vmem>>, %arg5: memref<128x128xbf16, #tpu.memory_space<vmem>>, %arg6: memref<1x128xf32, #tpu.memory_space<vmem>>, %arg7: memref<16x128xf32, #tpu.memory_space<vmem>>) attributes {dimension_semantics = [#tpu.dimension_semantics<parallel>, #tpu.dimension_semantics<parallel>, #tpu.dimension_semantics<arbitrary>], iteration_bounds = array<i64: 1, 2, 3>, scalar_prefetch = 1 : i64, scratch_operands = 0 : i64, tpu.core_type = #tpu.core_type<tc>, window_params = [{transform_indices = @transform_0, window_bounds = array<i64: 16, 128>}, {transform_indices = @transform_1, window_bounds = array<i64: 128, 128>}, {transform_indices = @transform_2, window_bounds = array<i64: 1, 128>}, {transform_indices = @transform_3, window_bounds = array<i64: 16, 128>}]} {
    %c0 = arith.constant 0 : index
    %c0_0 = arith.constant 0 : index
    %0 = vector.load %arg4[%c0, %c0_0] : memref<16x128xbf16, #tpu.memory_space<vmem>>, vector<16x128xbf16>
    %c0_1 = arith.constant 0 : index
    %c0_2 = arith.constant 0 : index
    %1 = vector.load %arg5[%c0_1, %c0_2] : memref<128x128xbf16, #tpu.memory_space<vmem>>, vector<128x128xbf16>
    %cst = arith.constant dense<0.000000e+00> : vector<16x128xf32>
    %2 = tpu.matmul %0, %1, %cst {dimension_numbers = #tpu.dot_dimension_numbers<[1], [0], [0], [1], [0, 0, 1, 1], [], []>} : vector<16x128xbf16>, vector<128x128xbf16>, vector<16x128xf32> -> vector<16x128xf32>
    %c0_i32 = arith.constant 0 : i32
    %3 = arith.cmpi eq, %arg2, %c0_i32 : i32
    %4 = arith.extui %3 : i1 to i32
    %c0_i32_3 = arith.constant 0 : i32
    %5 = arith.cmpi ne, %4, %c0_i32_3 : i32
    scf.if %5 {
      %c0_7 = arith.constant 0 : index
      %c0_8 = arith.constant 0 : index
      %12 = vector.load %arg7[%c0_7, %c0_8] : memref<16x128xf32, #tpu.memory_space<vmem>>, vector<16x128xf32>
      tpu.vector_store %arg7[%c0_7, %c0_8], %2 {strides = array<i32>} : memref<16x128xf32, #tpu.memory_space<vmem>>, vector<16x128xf32>,
    } else {
    }
    %c0_i32_4 = arith.constant 0 : i32
    %6 = arith.cmpi sgt, %arg2, %c0_i32_4 : i32
    %7 = arith.extui %6 : i1 to i32
    %c0_i32_5 = arith.constant 0 : i32
    %8 = arith.cmpi ne, %7, %c0_i32_5 : i32
    scf.if %8 {
      %c0_7 = arith.constant 0 : index
      %c0_8 = arith.constant 0 : index
      %12 = vector.load %arg7[%c0_7, %c0_8] : memref<16x128xf32, #tpu.memory_space<vmem>>, vector<16x128xf32>
      %13 = arith.addf %12, %2 : vector<16x128xf32>
      %c0_9 = arith.constant 0 : index
      %c0_10 = arith.constant 0 : index
      %14 = vector.load %arg7[%c0_9, %c0_10] : memref<16x128xf32, #tpu.memory_space<vmem>>, vector<16x128xf32>
      tpu.vector_store %arg7[%c0_9, %c0_10], %13 {strides = array<i32>} : memref<16x128xf32, #tpu.memory_space<vmem>>, vector<16x128xf32>,
    } else {
    }
    %c2_i32 = arith.constant 2 : i32
    %9 = arith.cmpi eq, %arg2, %c2_i32 : i32
    %10 = arith.extui %9 : i1 to i32
    %c0_i32_6 = arith.constant 0 : i32
    %11 = arith.cmpi ne, %10, %c0_i32_6 : i32
    scf.if %11 {
      %c0_7 = arith.constant 0 : index
      %c0_8 = arith.constant 0 : index
      %12 = vector.load %arg7[%c0_7, %c0_8] : memref<16x128xf32, #tpu.memory_space<vmem>>, vector<16x128xf32>
      %c0_9 = arith.constant 0 : index
      %c0_10 = arith.constant 0 : index
      %13 = vector.load %arg6[%c0_9, %c0_10] : memref<1x128xf32, #tpu.memory_space<vmem>>, vector<1x128xf32>
      %14 = vector.broadcast %13 : vector<1x128xf32> to vector<16x128xf32>
      %15 = arith.addf %12, %14 : vector<16x128xf32>
      %cst_11 = arith.constant 0.000000e+00 : f32
      %16 = vector.broadcast %cst_11 : f32 to vector<16x128xf32>
      %17 = arith.maximumf %15, %16 : vector<16x128xf32>
      %c0_12 = arith.constant 0 : index
      %c0_13 = arith.constant 0 : index
      %18 = vector.load %arg7[%c0_12, %c0_13] : memref<16x128xf32, #tpu.memory_space<vmem>>, vector<16x128xf32>
      tpu.vector_store %arg7[%c0_12, %c0_13], %17 {strides = array<i32>} : memref<16x128xf32, #tpu.memory_space<vmem>>, vector<16x128xf32>,
    } else {
    }
    return
  }
  func.func @transform_0(%arg0: i32, %arg1: i32, %arg2: i32, %arg3: memref<1xi32, #tpu.memory_space<smem>>) -> (i32, i32) {
    %c0_i32 = arith.constant 0 : i32
    return %arg0, %arg2 : i32, i32
  }
  func.func @transform_1(%arg0: i32, %arg1: i32, %arg2: i32, %arg3: memref<1xi32, #tpu.memory_space<smem>>) -> (i32, i32) {
    %c0_i32 = arith.constant 0 : i32
    return %arg2, %arg1 : i32, i32
  }
  func.func @transform_2(%arg0: i32, %arg1: i32, %arg2: i32, %arg3: memref<1xi32, #tpu.memory_space<smem>>) -> (i32, i32) {
    %c0_i32 = arith.constant 0 : i32
    %c0_i32_0 = arith.constant 0 : i32
    return %c0_i32, %arg1 : i32, i32
  }
  func.func @transform_3(%arg0: i32, %arg1: i32, %arg2: i32, %arg3: memref<1xi32, #tpu.memory_space<smem>>) -> (i32, i32) {
    %c0_i32 = arith.constant 0 : i32
    return %arg0, %arg1 : i32, i32
  }
}

</mosaic_0001>

<bundles_post_ra>
// kernel: tpu_custom_call.1
= control target key start
LH: loop header
LB: loop body
LE: loop exit
PB: predicated region body
PF: predicated region fallthrough
CT: control target
= control target key end

     0   :  { %s1435_s0 = inlined_call_operand.<no memory space> [shape: s32[1], index: 0, kind: input, shape index: {}]   ;;  %s1436_s1 = inlined_call_operand.hbm [shape: bf16[16,384], index: 1, kind: input, shape index: {}]   ;;  %s1437_s2 = inlined_call_operand.hbm [shape: bf16[384,256], index: 2, kind: input, shape index: {}]   ;;  %s1438_s3 = inlined_call_operand.vmem [shape: f32[1,256], index: 3, kind: input, shape index: {}]   ;;  %s1439_s4 = inlined_call_operand.hbm [shape: f32[16,256], index: 4, kind: output, shape index: {}]  }
   0x1   :  { %1452 = sst [smem:[#allocation18_spill]] %s1436_s1 }
   0x2   :  { %1453 = sst [smem:[#allocation19_spill]] %s1439_s4 }
   0x3   :  { %10 = vsyncpa [#allocation5], 0 }
   0x4   :  { %12 = vsyncpa [#allocation5 + $0x1], 0 }
   0x5   :  { %13 = vsyncpa [#allocation8], 0 }
   0x6   :  { %15 = vsyncpa [#allocation8 + $0x1], 0 }
   0x7   :  { %16 = vsyncpa [#allocation6], 0 }
   0x8   :  { %18 = vsyncpa [#allocation6 + $0x1], 0  ;;  %s1026_s15 = smov 0   ;;  %s1028_s0 = smov 0  }
   0x9   :  { %s1030_s16 = smov 0   ;;  %s1032_s17 = smov 0  }
   0xa   :  { %s1034_s18 = smov 0   ;;  %s1036_s19 = smov 0  }
   0xb   :  { %s1038_s20 = smov 0   ;;  %s1040_s21 = smov 0  }
   0xc   :  { %s1042_s22 = smov 0   ;;  %s1044_s23 = smov 0  }
   0xd   :  { %s1046_s24 = smov 0   ;;  %s1048_s25 = smov 0  }
   0xe   :  { %s1050_s26 = smov 0   ;;  %s1052_s27 = smov 0  }
   0xf LB: > { %1454 = sst [smem:[#allocation13_spill]] %s967_s22  ;;  %s567_s28 = sadd.s32 4294967295, %s987_s27   ;;  %s987_s27 = sphi %s1052_s27, %s24_s27   ;;  %s983_s26 = sphi %s1050_s26, %s1502_s26   ;;  %s979_s25 = sphi %s1048_s25, %s1501_s25   ;;  %s975_s24 = sphi %s1046_s24, %s1500_s24   ;;  %s971_s23 = sphi %s1044_s23, %s1499_s23   ;;  %s967_s22 = sphi %s1042_s22, %s1488_s22   ;;  %s963_s21 = sphi %s1040_s21, %s1498_s21   ;;  %s959_s20 = sphi %s1038_s20, %s1497_s20   ;;  %s955_s19 = sphi %s1036_s19, %s1496_s19   ;;  %s951_s18 = sphi %s1034_s18, %s1495_s18   ;;  %s947_s17 = sphi %s1032_s17, %s1494_s17   ;;  %s943_s16 = sphi %s1030_s16, %s1493_s16   ;;  %s939_s0 = sphi %s1028_s0, %s1492_s0   ;;  %s935_s15 = sphi %s1026_s15, %s1491_s15  }
  0x10   : > { %1455 = sst [smem:[#allocation14_spill]] %s971_s23  ;;  %s36_s29 = sadd.s32 1, %s979_s25 }
  0x11   : > { %p1096_p0 = scmp.ge.s32.totalorder %s36_s29, 3  ;;  %s52_s5 = sadd.s32 1, %s967_s22 }
  0x12   : > { %p59_p1 = scmp.ne.s32.totalorder %s967_s22, %s963_s21  ;;  %p1443_p2 = scmp.eq.s32.totalorder %s987_s27, 0 }
  0x13   : > { %s1504_s29 = smov (%p1096_p0, %s36_s29), 0  ;;  %p65_p4 = scmp.ne.s32.totalorder %s963_s21, %s959_s20 }
  0x14   : > { %1457 = sst [smem:[#allocation15_spill]] %s1504_s29  ;;  %p1110_p3 = por %p1443_p2, %p59_p1 }
  0x15   : > { %s1117_s7 = ssub.s32 %s979_s25, %s1504_s29  ;;  %p1119_p5 = scmp.eq.s32.totalorder %s567_s28, 0 }
  0x16   : > { %p50_p6 = scmp.eq.s32.totalorder %s1117_s7, 0  ;;  %p1124_p7 = scmp.eq.s32.totalorder %s567_s28, 5 }
  0x17   : > { %s1459_s8 = scalar_select %p1119_p5, 1, 0 }
  0x18   : > { %s1460_s9 = scalar_select %p1124_p7, 1, 0 }
  0x19   : > { %p1130_p8 = por %p1119_p5, %p65_p4  ;;  %p1442_p9 = scmp.lt.s32.totalorder %s987_s27, 6 }
  0x1a   : > { %s1135_s11 = scalar_select %p50_p6, %s967_s22, %s52_s5  }
  0x1b   : > { %s1461_s10 = scalar_select %p1130_p8, 1, 0 }
  0x1c   : > { %1462 = sst [smem:[#allocation16_spill]] %s1135_s11  ;;  %s171_s12 = sand.u32 1, %s967_s22  }
  0x1d   : > { %s571_s13 = sshll.u32 %s171_s12, 3  ;;  %s572_s14 = sshll.u32 %s979_s25, 6 }
  0x1e   : > { %s1463_s1 = sld [smem:[#allocation18_spill]]  ;;  %s175_s28 = scalar_lea.vmem [#allocation4], %s571_s13 }
  0x1f   : > { %s184_s23 = sshll.u32 %s175_s28, 4  ;;  %p1151_p10 = pnand %p1442_p9, %p1110_p3  ;;  %s1145_s23 = int_to_ptr.vmem [resolvable:$true] %s184_s23 }
  0x20   : > { %s1155_s11 = scalar_lea.sflag [#allocation5], %s171_s12 }
  0x21   : > { %p779_p12 = pneg %p1151_p10 }
  0x24   : > { %s1143_s4 = scalar_lea.hbm %s1463_s1, %s572_s14  ;;  %s782_s6 = scalar_lea.hbm %s1463_s1, 384 }
  0x25   : > { %s777_s29 = scalar_lea.hbm %s1143_s4, 128  ;;  %p783_p3 = scmp.lt.u32.totalorder %s1143_s4, %s1463_s1 }
  0x26   : > { %p778_p11 = scmp.ne.s32.totalorder %s1143_s4, %s777_s29  ;;  %p784_p4 = scmp.lt.u32.totalorder %s782_s6, %s777_s29 }
  0x27   : > { %p786_p9 = scmp.lt.u32.totalorder %s777_s29, %s1143_s4 }
  0x28   : > { %p780_p13 = pnand %p779_p12, %p778_p11  ;;  %p785_p6 = por %p784_p4, %p783_p3 }
  0x2a   : > { %p781_p1 = pneg %p780_p13  ;;  %p787_p2 = por %p786_p9, %p785_p6 }
  0x2c   : > { %p788_p8 = pnand %p787_p2, %p781_p1 }
  0x2e   : > { %791 = shalt.err (!%p788_p8)
}
  0x2f   : > { %s792_s12 = scalar_lea.vmem %s1145_s23, 128  ;;  %s989_s13 = smov [#allocation4]  }
  0x30   : > { %p793_p11 = scmp.ne.s32.totalorder %s1145_s23, %s792_s12  ;;  %s797_s14 = sshll.u32 %s989_s13, 4  ;;  %s798_s14 = int_to_ptr.vmem [resolvable:$false] %s797_s14 }
  0x31   : > { %s799_s20 = scalar_lea.vmem %s798_s14, 256  ;;  %p800_p5 = scmp.lt.s32.totalorder %s1145_s23, %s798_s14 }
  0x32   : > { %p795_p13 = pnand %p793_p11, %p779_p12  ;;  %p801_p3 = scmp.lt.s32.totalorder %s799_s20, %s792_s12 }
  0x34   : > { %p796_p7 = pneg %p795_p13  ;;  %p802_p4 = por %p801_p3, %p800_p5 }
  0x36   : > { %p803_p9 = pnand %p802_p4, %p796_p7 }
  0x38   : > { %806 = shalt.err (!%p803_p9)
}
  0x39   : > { %s990_s29 = smov 192   ;;  %s1446_s6 = smov 64  }
  0x3a   : > { %s1447_s28 = smov 4   ;;  %p577_p2 = scmp.ge.s32.totalorder %s987_s27, 1 }
  0x3b   : > { %637 = dma.hbm_to_vmem [thread:$0]  (!%p1151_p10), %s1143_s4, 128, %s1145_s23, %s1155_s11, %s990_s29, %s1446_s6, %s1447_s28  }
  0x3c   : > { %p221_p5 = scmp.lt.s32.totalorder %s987_s27, 7  ;;  %s568_s13 = sadd.s32 4294967294, %s987_s27  }
  0x3d   : > { %s39_s14 = sadd.s32 1, %s983_s26  ;;  %s80_s20 = sadd.s32 1, %s955_s19 }
  0x3e   : > { %p1187_p7 = pnand %p577_p2, %p221_p5  ;;  %s1506_s14 = smov (!%p1096_p0, %s39_s14), %s983_s26 }
  0x3f   : > { %p87_p8 = scmp.ne.s32.totalorder %s955_s19, %s951_s18  ;;  %p93_p10 = scmp.ne.s32.totalorder %s951_s18, %s947_s17 }
  0x40   : > { %p41_p12 = scmp.ge.s32.totalorder %s1506_s14, 2  ;;  %s134_s4 = sadd.s32 1, %s943_s16 }
  0x41   : > { %p1466_p1 = scmp.eq.s32.totalorder %s987_s27, 0  ;;  %p1468_p11 = scmp.ne.s32.totalorder %s1459_s8, 0 }
  0x42   : > { %s1508_s14 = smov (%p41_p12, %s1506_s14), 0  ;;  %p144_p0 = scmp.ne.s32.totalorder %s943_s16, %s939_s0 }
  0x43   : > { %p1204_p6 = por %p87_p8, %p1466_p1  ;;  %p1210_p13 = por %p93_p10, %p1468_p11 }
  0x44   : > { %1470 = sst [smem:[#allocation17_spill]] %s1508_s14  ;;  %p150_p3 = scmp.ne.s32.totalorder %s939_s0, %s935_s15 }
  0x45   : > { %s1469_s11 = scalar_select %p1210_p13, 1, 0 }
  0x46   : > { %s76_s17 = ssub.s32 %s983_s26, %s1508_s14  ;;  %p151_p4 = scmp.eq.s32.totalorder %s568_s13, 5 }
  0x47   : > { %s77_s30 = sor.u32 %s76_s17, %s1117_s7  ;;  %p132_p9 = scmp.eq.s32.totalorder %s76_s17, 0 }
  0x48   : > { %p78_p2 = scmp.eq.s32.totalorder %s77_s30, 0  ;;  %p1471_p5 = scmp.ne.s32.totalorder %s1460_s9, 0 }
  0x49   : > { %s1230_s5 = scalar_select %p132_p9, %s943_s16, %s134_s4  }
  0x4a   : > { %p1225_p8 = por %p1471_p5, %p144_p0  ;;  %p1235_p10 = por %p151_p4, %p150_p3 }
  0x4b   : > { %s1233_s29 = scalar_select %p78_p2, %s955_s19, %s80_s20  }
  0x4c   : > { %s1472_s8 = scalar_select %p1225_p8, 1, 0 }
  0x4d   : > { %s1473_s6 = scalar_select %p1235_p10, 1, 0 }
  0x4e   : > { %s194_s28 = sand.u32 1, %s955_s19   ;;  %s598_s7 = sshll.u32 %s979_s25, 5 }
  0x4f   : > { %s573_s13 = sshll.u32 %s194_s28, 6  ;;  %s204_s1 = sadd.s32 %s983_s26, %s598_s7 }
  0x50   : > { %s198_s14 = scalar_lea.vmem [#allocation7], %s573_s13  ;;  %s576_s30 = sshll.u32 %s204_s1, 6 }
  0x51   : > { %s207_s17 = sshll.u32 %s198_s14, 4  ;;  %s1247_s4 = scalar_lea.hbm %s1437_s2, %s576_s30  ;;  %s1242_s17 = int_to_ptr.vmem [resolvable:$true] %s207_s17 }
  0x52   : > { %p1474_p12 = scmp.lt.s32.totalorder %s987_s27, 6  ;;  %s1257_s1 = scalar_lea.sflag [#allocation8], %s194_s28 }
  0x53   : > { %s807_s14 = scalar_lea.hbm %s1247_s4, 1024  ;;  %s812_s13 = scalar_lea.hbm %s1437_s2, 6144 }
  0x54   : > { %p1253_p1 = pnand %p1474_p12, %p1204_p6  ;;  %p808_p11 = scmp.ne.s32.totalorder %s1247_s4, %s807_s14 }
  0x55   : > { %p813_p6 = scmp.lt.u32.totalorder %s1247_s4, %s1437_s2  ;;  %p814_p9 = scmp.lt.u32.totalorder %s812_s13, %s807_s14 }
  0x56   : > { %p809_p0 = pneg %p1253_p1  ;;  %p816_p5 = scmp.lt.u32.totalorder %s807_s14, %s1247_s4 }
  0x57   : > { %p815_p2 = por %p814_p9, %p813_p6 }
  0x58   : > { %p810_p3 = pnand %p809_p0, %p808_p11 }
  0x59   : > { %p817_p12 = por %p816_p5, %p815_p2 }
  0x5a   : > { %p811_p4 = pneg %p810_p3 }
  0x5c   : > { %p818_p10 = pnand %p817_p12, %p811_p4 }
  0x5e   : > { %821 = shalt.err (!%p818_p10)
}
  0x5f   : > { %s822_s28 = scalar_lea.vmem %s1242_s17, 1024  ;;  %s993_s9 = smov [#allocation7]  }
  0x60   : > { %p823_p11 = scmp.ne.s32.totalorder %s1242_s17, %s822_s28  ;;  %s827_s22 = sshll.u32 %s993_s9, 4  ;;  %s828_s22 = int_to_ptr.vmem [resolvable:$false] %s827_s22 }
  0x61   : > { %s829_s23 = scalar_lea.vmem %s828_s22, 2048  ;;  %p830_p13 = scmp.lt.s32.totalorder %s1242_s17, %s828_s22 }
  0x62   : > { %p825_p3 = pnand %p823_p11, %p809_p0  ;;  %p831_p6 = scmp.lt.s32.totalorder %s829_s23, %s822_s28 }
  0x64   : > { %p826_p8 = pneg %p825_p3  ;;  %p832_p9 = por %p831_p6, %p830_p13 }
  0x66   : > { %p833_p2 = pnand %p832_p9, %p826_p8 }
  0x68   : > { %836 = shalt.err (!%p833_p2)
}
  0x69   : > { %s994_s14 = smov 128   ;;  %s1476_s13 = smov 4  }
  0x6a   : > { %s1477_s7 = smov 64   ;;  %225 = sbr.rel (%p1187_p7) target bundleno = 424 (0x1a8), region = 32 }
  0x6b   : > { %640 = dma.hbm_to_vmem [thread:$0]  (!%p1253_p1), %s1247_s4, 1024, %s1242_s17, %s1257_s1, %s994_s14, %s1477_s7, %s1476_s13  }
  0x6c   : > { %s227_s30 = sand.u32 (!%p1187_p7), 1, %s963_s21   ;;  %p1478_p13 = scmp.ne.s32.totalorder (!%p1187_p7), %s1461_s10, 0 }
  0x6d   : > { %s1290_s9 = sshll.u32 (!%p1187_p7), %s227_s30, 3  ;;  %s228_s28 = scalar_lea.sflag (!%p1187_p7), [#allocation5], %s227_s30 }
  0x6e   : > { %s231_s22 = scalar_lea.vmem (!%p1187_p7), [#allocation4], %s1290_s9 }
  0x71   : > { %922 = dma.done.wait (%p1478_p13), %s228_s28, 128  }
  0x72   : > { %924 = vsyncadd (%p1478_p13), %s228_s28, 4294967168  ;;  %s236_s20 = sand.u32 1, %s951_s18   ;;  %p1479_p7 = scmp.ne.s32.totalorder %s1469_s11, 0 }
  0x73   : > { %s579_s17 = sshll.u32 %s236_s20, 6  ;;  %s237_s4 = scalar_lea.sflag [#allocation8], %s236_s20 }
  0x74   : > { %s1298_s12 = scalar_lea.vmem [#allocation7], %s579_s17 }
  0x75   : > { %926 = dma.done.wait (%p1479_p7), %s237_s4, 1024  }
  0x76   : > { %928 = vsyncadd (%p1479_p7), %s237_s4, 4294966272  ;;  %s268_s10 = sand.u32 1, %s939_s0   ;;  %p273_p8 = scmp.lt.s32.totalorder %s975_s24, 1  ;;  %v995_v0 = vmov 0.0   ;;  %vm996_vm0 = vmmov 0   ;;  %v768_v1 = vld [vmem:[%s1298_s12] sm:$0xff]  }
  0x77   : > { %s1308_s1 = sshll.u32 %s268_s10, 4  ;;  %608 = vmatprep.subr.bf16.mxu0 %v995_v0  ;;  %624 = vmatprep.mubr.msk.bf16.mxu0 %vm996_vm0, %v995_v0  ;;  %v769_v2 = vld [vmem:[%s1298_s12 + $0x8] sm:$0xff]   ;;  %v770_v3 = vld [vmem:[%s1298_s12 + $0x10] sm:$0xff]   ;;  %v771_v4 = vld [vmem:[%s1298_s12 + $0x18] sm:$0xff]   ;;  %s1480_s30 = sld [smem:[#allocation14_spill]] }
  0x78   : > { %s1311_s11 = scalar_select %p273_p8, %s975_s24, 1  ;;  %609 = vmatpush3.bf16.msra.mxu0 %v768_v1  ;;  %v772_v5 = vld [vmem:[%s1298_s12 + $0x20] sm:$0xff]   ;;  %v773_v6 = vld [vmem:[%s1298_s12 + $0x28] sm:$0xff]   ;;  %v774_v7 = vld [vmem:[%s1298_s12 + $0x30] sm:$0xff]  }
  0x79   : > { %610 = vmatprep.subr.bf16.mxu0 %v995_v0  ;;  %v775_v8 = vld [vmem:[%s1298_s12 + $0x38] sm:$0xff]   ;;  %s1328_s7 = scalar_lea.vmem [#allocation9], %s1308_s1 }
  0x7a   : > { %s275_s13 = scalar_lea.vmem %s1438_s3, %s1311_s11  ;;  %v776_v9 = vld [vmem:[%s231_s22] sm:$0xff]  }
  0x7c   : > { %611 = vmatpush3.bf16.msra.mxu0 %v769_v2 }
  0x7d   : > { %612 = vmatprep.subr.bf16.mxu0 %v995_v0  ;;  %p590_p10 = scmp.ne.s32.totalorder %s1480_s30, 0 }
  0x80   : > { %613 = vmatpush3.bf16.msra.mxu0 %v770_v3 }
  0x81   : > { %614 = vmatprep.subr.bf16.mxu0 %v995_v0 }
  0x84   : > { %615 = vmatpush3.bf16.msra.mxu0 %v771_v4 }
  0x85   : > { %616 = vmatprep.subr.bf16.mxu0 %v995_v0 }
  0x88   : > { %617 = vmatpush3.bf16.msra.mxu0 %v772_v5 }
  0x89   : > { %618 = vmatprep.subr.bf16.mxu0 %v995_v0 }
  0x8c   : > { %619 = vmatpush3.bf16.msra.mxu0 %v773_v6 }
  0x8d   : > { %620 = vmatprep.subr.bf16.mxu0 %v995_v0 }
  0x90   : > { %621 = vmatpush3.bf16.msra.mxu0 %v774_v7 }
  0x91   : > { %622 = vmatprep.subr.bf16.mxu0 %v995_v0 }
  0x94   : > { %623 = vmatpush3.bf16.msra.mxu0 %v775_v8 }
  0x97   : > { %625 = vmatmul.mubr.bf16.vlgmr.msra.gmra.mrb[0].mxu0 %v776_v9 }
 0x167   : > { %394 = sbr.rel (%p590_p10) target bundleno = 366 (0x16e), region = 44 }
 0x16a   : > { %v384_v10 = vpop.f32.mrb[0].mxu0 }
 0x16b   : > { %v626_v11 = vpop.f32.mrb[1].mxu0  ;;  %395 = vst [vmem:[%s1328_s7] sm:$0xff] (!%p590_p10), %v384_v10 }
 0x16c   : > { %v387_v12 = vpop.f32.mrb[2].mxu0 }
 0x16d   : > { %v627_v13 = vpop.f32.mrb[3].mxu0  ;;  %396 = vst [vmem:[%s1328_s7 + $0x8] sm:$0xff] (!%p590_p10), %v387_v12 }
 0x16e PF: > { %s1481_s28 = sld [smem:[#allocation14_spill]] }
 0x174   : > { %p591_p1 = scmp.le.s32.totalorder %s1481_s28, 0 }
 0x175   : > { %v401_v14 = vld [vmem:[%s1328_s7] sm:$0xff] (!%p591_p1)  ;;  %v402_v15 = vld [vmem:[%s1328_s7 + $0x8] sm:$0xff] (!%p591_p1) }
 0x176   : > { %400 = sbr.rel (%p591_p1) target bundleno = 381 (0x17d), region = 48  ;;  %v403_v16 = vadd.f32 (!%p591_p1), %v401_v14, %v384_v10  ;;  %v404_v17 = vadd.f32 (!%p591_p1), %v402_v15, %v387_v12 }
 0x178   : > { %405 = vst [vmem:[%s1328_s7] sm:$0xff] (!%p591_p1), %v403_v16  ;;  %406 = vst [vmem:[%s1328_s7 + $0x8] sm:$0xff] (!%p591_p1), %v404_v17 }
 0x17d PF: > { %s1482_s9 = sld [smem:[#allocation14_spill]] }
 0x183   : > { %p592_p0 = scmp.ne.s32.totalorder %s1482_s9, 2 }
 0x184   : > { %v411_v18 = vld [vmem:[%s1328_s7] sm:$0xff] (!%p592_p0)  ;;  %v412_v20 = vld [vmem:[%s1328_s7 + $0x8] sm:$0xff] (!%p592_p0) }
 0x185   : > { %410 = sbr.rel (%p592_p0) target bundleno = 396 (0x18c), region = 52  ;;  %v593_v19 = vld [vmem:[%s275_s13] ss:$0 sm:$0xff] (!%p592_p0) }
 0x186   : > { %v420_v21 = vadd.f32 (!%p592_p0), %v593_v19, %v411_v18  ;;  %v421_v22 = vadd.f32 (!%p592_p0), %v593_v19, %v412_v20 }
 0x188   : > { %v422_v23 = vmax.f32 (!%p592_p0), %v420_v21, 0.0  ;;  %v423_v24 = vmax.f32 (!%p592_p0), %v421_v22, 0.0 }
 0x18a   : > { %424 = vst [vmem:[%s1328_s7] sm:$0xff] (!%p592_p0), %v422_v23  ;;  %425 = vst [vmem:[%s1328_s7 + $0x8] sm:$0xff] (!%p592_p0), %v423_v24 }
 0x18c PF: > { %s595_s17 = sshll.u32 %s975_s24, 7  ;;  %s1483_s1 = sld [smem:[#allocation19_spill]] }
 0x18d   : > { %s442_s11 = sshll.u32 %s1328_s7, 4  ;;  %s1359_s14 = scalar_lea.sflag [#allocation6], %s268_s10  ;;  %s1355_s11 = int_to_ptr.vmem [resolvable:$true] %s442_s11 }
 0x18e   : > { %s837_s13 = scalar_lea.vmem %s1355_s11, 256  ;;  %p1484_p5 = scmp.ne.s32.totalorder %s1472_s8, 0 }
 0x18f   : > { %p838_p4 = scmp.ne.s32.totalorder %s1355_s11, %s837_s13  ;;  %s997_s24 = smov [#allocation9]  }
 0x190   : > { %s841_s30 = sshll.u32 %s997_s24, 4  ;;  %s842_s30 = int_to_ptr.vmem [resolvable:$false] %s841_s30 }
 0x191   : > { %p839_p12 = pnand %p838_p4, %p1484_p5  ;;  %s843_s28 = scalar_lea.vmem %s842_s30, 512 }
 0x192   : > { %s1352_s23 = scalar_lea.hbm %s1483_s1, %s595_s17  ;;  %p844_p3 = scmp.lt.s32.totalorder %s1355_s11, %s842_s30 }
 0x193   : > { %p840_p11 = pneg %p839_p12  ;;  %p845_p6 = scmp.lt.s32.totalorder %s843_s28, %s837_s13 }
 0x195   : > { %p846_p9 = por %p845_p6, %p844_p3 }
 0x197   : > { %p847_p2 = pnand %p846_p9, %p840_p11 }
 0x199   : > { %850 = shalt.err (!%p847_p2)
}
 0x19a   : > { %s851_s10 = scalar_lea.hbm %s1352_s23, 256  ;;  %s855_s22 = scalar_lea.hbm %s1483_s1, 512 }
 0x19b   : > { %p852_p13 = scmp.ne.s32.totalorder %s1352_s23, %s851_s10  ;;  %p856_p10 = scmp.lt.u32.totalorder %s1352_s23, %s1483_s1 }
 0x19c   : > { %p857_p1 = scmp.lt.u32.totalorder %s855_s22, %s851_s10  ;;  %p859_p4 = scmp.lt.u32.totalorder %s851_s10, %s1352_s23 }
 0x19d   : > { %p853_p7 = pnand %p852_p13, %p1484_p5 }
 0x19e   : > { %p858_p0 = por %p857_p1, %p856_p10 }
 0x19f   : > { %p854_p8 = pneg %p853_p7 }
 0x1a0   : > { %p860_p12 = por %p859_p4, %p858_p0 }
 0x1a2   : > { %p861_p11 = pnand %p860_p12, %p854_p8 }
 0x1a4   : > { %864 = shalt.err (!%p861_p11)
}
 0x1a5   : > { %s998_s4 = smov 128   ;;  %s999_s12 = smov 256  }
 0x1a6   : > { %s1000_s13 = smov 8  }
 0x1a7   : > { %632 = dma.vmem_to_hbm [thread:$0]  (%p1484_p5), %s1355_s11, 256, %s1352_s23, %s1359_s14, %s998_s4, %s999_s12, %s1000_s13  }
 0x1a8 PF: > { %p646_p3 = scmp.ge.s32.totalorder %s987_s27, 2  ;;  %s457_s24 = sand.u32 1, %s935_s15  }
 0x1a9   : > { %p1485_p6 = scmp.ne.s32.totalorder %s1473_s6, 0  ;;  %s458_s30 = scalar_lea.sflag [#allocation6], %s457_s24 }
 0x1ab   : > { %p642_p9 = pnand %p646_p3, %p1485_p6 }
 0x1ad   : > { %930 = dma.done.wait (!%p642_p9), %s458_s30, 256  }
 0x1ae   : > { %932 = vsyncadd (!%p642_p9), %s458_s30, 4294967040  ;;  %s24_s27 = sadd.s32 1, %s987_s27   ;;  %s1487_s8 = sld [smem:[#allocation13_spill]] }
 0x1af   : > { %p1388_p2 = scmp.ge.s32.totalorder %s24_s27, 8   ;;  %s1488_s22 = sld [smem:[#allocation16_spill]] }
 0x1b0   : > { %s1489_s6 = sld [smem:[#allocation15_spill]]  ;;  %s1490_s11 = sld [smem:[#allocation17_spill]] }
 0x1b1   : > { %s1491_s15 = smov %s939_s0  ;;  %s1492_s0 = smov %s943_s16 }
 0x1b2   : > { %s1493_s16 = smov %s1230_s5  ;;  %s1494_s17 = smov %s951_s18 }
 0x1b3   : > { %s1495_s18 = smov %s955_s19  ;;  %s1496_s19 = smov %s1233_s29 }
 0x1b4   : > { %s1497_s20 = smov %s963_s21  ;;  %s1498_s21 = smov %s1487_s8 }
 0x1b5   : > { %s1499_s23 = smov %s979_s25  ;;  %s1500_s24 = smov %s983_s26 }
 0x1b6   : > { %s1501_s25 = smov %s1489_s6  ;;  %s1502_s26 = smov %s1490_s11 }
 0x1b7   :  { %23 = sbr.rel (!%p1388_p2) target bundleno = 15 (0xf), region = 105 }
 0x1be   :  { %463 = vsyncpa [#allocation5], 1 }
 0x1bf   :  { %465 = vsyncpa [#allocation5 + $0x1], 1 }
 0x1c0   :  { %466 = vsyncpa [#allocation8], 1 }
 0x1c1   :  { %468 = vsyncpa [#allocation8 + $0x1], 1 }
 0x1c2   :  { %469 = vsyncpa [#allocation6], 1 }
 0x1c3   :  { %471 = vsyncpa [#allocation6 + $0x1], 1 }

</bundles_post_ra>
